<compile_context>
chip_gen: v6e
topology: v6e:2x2x1
jax: 0.10.0
libtpu: 0.0.40
codegen_flags: <defaults>
</compile_context>

<pallas_src>
import numpy as np
import jax
import jax.numpy as jnp
from jax import lax
from jax.experimental import pallas as pl
from jax.experimental.pallas import tpu as pltpu

EPS = 1e-5      # nn.LayerNorm default eps
NEG = -1e30     # masked-attention fill value
NUM_HEADS = 8   # MultiHeadAttention(num_heads=8)


# ----------------------------- shared math helpers -----------------------------
def _layernorm(x, g, b):
    mu = jnp.mean(x, axis=-1, keepdims=True)
    xc = x - mu
    var = jnp.mean(xc * xc, axis=-1, keepdims=True)
    return xc * lax.rsqrt(var + EPS) * g + b


def _relu(x):
    return jnp.maximum(x, 0.0)


def _bdot(a, b):
    # bf16 operands on the MXU, f32 accumulation.
    return jnp.dot(a.astype(jnp.bfloat16), b.astype(jnp.bfloat16),
                   preferred_element_type=jnp.float32)


def _full_spec(shape):
    nd = len(shape)
    return pl.BlockSpec(shape, lambda *args, _nd=nd: (0,) * _nd)


def _choose_time_tile(T, Bp, max_rows=2048):
    # Largest divisor of T such that (a) the grid has >= 2 steps, so the "parallel" time
    # axis can shard across v7x's two TensorCores, and (b) tb*Bp matmul rows stay bounded
    # (VMEM-friendly blocks while still filling MXU rows / amortizing grid-step overhead).
    best = 1
    for d in range(1, T + 1):
        if T % d == 0 and d * Bp <= max_rows and (T // d >= 2 or T == 1):
            best = d
    return best


# ----------------------------- kernel 1: encoder -----------------------------
def _encode_kernel(x_ref, pe_ref, w1_ref, b1_ref, w2_ref, b2_ref, g_ref, be_ref,
                   wkv_ref, o_ref):
    tb, Bp, Xd = x_ref.shape
    H = w1_ref.shape[1]
    x2 = x_ref[...].reshape(tb * Bp, Xd)                                   # bf16
    h1 = _relu(_bdot(x2, w1_ref[...]) + b1_ref[...])
    h2 = _bdot(h1, w2_ref[...]) + b2_ref[...]
    h3 = h2.reshape(tb, Bp, H) + pe_ref[...]                               # (tb,1,H) bcast
    h = _layernorm(h3, g_ref[...], be_ref[...])                            # f32
    # fused loop-invariant K|V projection for attn_h (lane-dense 2H output)
    kv = _bdot(h.reshape(tb * Bp, H), wkv_ref[...])
    o_ref[...] = kv.reshape(tb, Bp, 2 * H).astype(jnp.bfloat16)


def _encode(x_tm, pe_h3, w1, b1, w2, b2, g, be, wkv_h):
    T, Bp, Xd = x_tm.shape
    H = w1.shape[1]
    tb = _choose_time_tile(T, Bp)
    weight_ins = (w1, b1, w2, b2, g, be, wkv_h)
    # TODO(synk): on v5e, fold this block into the recurrence kernel when T*Bp*2H fits
    # VMEM to skip the kvh HBM bounce and the second launch.
    return pl.pallas_call(
        _encode_kernel,
        out_shape=jax.ShapeDtypeStruct((T, Bp, 2 * H), jnp.bfloat16),
        grid_spec=pltpu.PrefetchScalarGridSpec(
            num_scalar_prefetch=0,
            grid=(T // tb,),
            in_specs=[pl.BlockSpec((tb, Bp, Xd), lambda i: (i, 0, 0)),
                      pl.BlockSpec((tb, 1, H), lambda i: (i, 0, 0))]
                     + [_full_spec(a.shape) for a in weight_ins],
            out_specs=pl.BlockSpec((tb, Bp, 2 * H), lambda i: (i, 0, 0)),
        ),
        compiler_params=pltpu.CompilerParams(dimension_semantics=("parallel",)),
    )(x_tm, pe_h3, *weight_ins)


# ----------------------------- kernel 2: recurrence -----------------------------
def _make_recurrence_kernel(Bs, T, H, Z, LOC):
    Hw = H // 2
    nh = NUM_HEADS

    def head_pool(C):
        hd = C // nh
        c_ids = lax.broadcasted_iota(jnp.int32, (C, nh), 0)
        h_ids = lax.broadcasted_iota(jnp.int32, (C, nh), 1)
        return ((c_ids // hd) == h_ids).astype(jnp.bfloat16)

    def head_pool_t(C):
        hd = C // nh
        h_ids = lax.broadcasted_iota(jnp.int32, (nh, C), 0)
        c_ids = lax.broadcasted_iota(jnp.int32, (nh, C), 1)
        return ((c_ids // hd) == h_ids).astype(jnp.bfloat16)

    def attend(qp, kp, vp, bias, pool, pool_t, wp, bp):
        # qp: (Bs, C) projected+scaled query (f32); kp/vp: (L, Bs, C) time-major bf16
        # keys/values; bias: (L, Bs, 1) additive mask.  All heads at once: per-head score
        # reduction is a (L*Bs, C) @ (C, nh) one-hot pooling matmul, and softmax
        # reductions run over the leading (time) axis = pure VPU adds.
        L, _, C = kp.shape
        prod = qp[None, :, :] * kp                                             # (L,Bs,C) f32
        s = _bdot(prod.reshape(L * Bs, C), pool).reshape(L, Bs, nh)
        s = s + bias
        s = s - jnp.max(s, axis=0, keepdims=True)
        e = jnp.exp(s)
        p = e * pl.reciprocal(jnp.sum(e, axis=0, keepdims=True), approx=True)  # (L,Bs,nh)
        pc = _bdot(p.reshape(L * Bs, nh), pool_t).reshape(L, Bs, C)
        o = jnp.sum(pc * vp, axis=0)                                            # (Bs,C)
        return _bdot(o, wp) + bp

    def kernel(mask_ref, kvh_ref, pe_w_ref,
               wq_w_ref, wkv_w_ref, wp_w_ref, bp_w_ref,
               g_wb_ref, b_wb_ref,
               wq_h_ref, wp_h_ref, bp_h_ref,
               g_wh_ref, b_wh_ref,
               pm_w1_ref, pm_b1_ref, zm_w_ref, zm_b_ref,
               pz_w1a_ref, pz_w1b_ref, pz_b1_ref, pz_w2_ref, pz_b2_ref,
               g_w_ref, b_w_ref,
               pw_w1_ref, pw_b1_ref, pw_w2_ref, pw_b2_ref,
               xpred_ref,
               kvw_buf, wseq_buf):
        pool_w, pool_w_t = head_pool(Hw), head_pool_t(Hw)
        pool_h, pool_h_t = head_pool(H), head_pool_t(H)

        # loop-invariant pieces (mask bias, precomputed h keys/values)
        nbias = jnp.where(mask_ref[...] > 0.5, 0.0, NEG)                       # (T, Bs, 1)
        kvh = kvh_ref[...]                                                      # (T, Bs, 2H) bf16
        kp_h = kvh[:, :, :H]
        vp_h = kvh[:, :, H:]
        j_ids = lax.broadcasted_iota(jnp.int32, (T, 1, 1), 0)

        # positions > t are masked out but must be finite (0 * NaN = NaN otherwise)
        kvw_buf[...] = jnp.zeros_like(kvw_buf)

        def step(t, wt):
            # append projected K|V for key index t (= w_t); only the new row is projected
            kvw_buf[pl.ds(t, 1), :, :] = _bdot(wt, wkv_w_ref[...]).astype(
                jnp.bfloat16)[None, :, :]

            # ---- attn_w over accumulated w's (obs-mask & causal-length masked) ----
            # TODO(synk): for long T, iterate this in 128-row time chunks (pl.ds +
            # pl.when skip past t) instead of reading the full kvw_buf every step.
            causal = jnp.where(j_ids <= t, 0.0, NEG)                           # (T, 1, 1)
            qp_w = _bdot(wt, wq_w_ref[...])
            kvw = kvw_buf[...]                                                 # (T, Bs, 2Hw)
            aw = attend(qp_w, kvw[:, :, :Hw], kvw[:, :, Hw:], nbias + causal,
                        pool_w, pool_w_t, wp_w_ref[...], bp_w_ref[...])        # (Bs, Hw)
            wbar = _layernorm(jnp.concatenate([wt, aw], axis=-1),
                              g_wb_ref[...], b_wb_ref[...])                    # (Bs, H)

            # ---- attn_h over encoded observations (K/V precomputed in kernel 1) ----
            qp_h = _bdot(wbar, wq_h_ref[...])
            ah = attend(qp_h, kp_h, vp_h, nbias,
                        pool_h, pool_h_t, wp_h_ref[...], bp_h_ref[...])        # (Bs, H)
            what = _layernorm(jnp.concatenate([wbar, ah], axis=-1),
                              g_wh_ref[...], b_wh_ref[...])                    # (Bs, 2H)

            # ---- prior_mlp with prior_mean folded into the 2nd layer (pm_w2 @ zm_w) ----
            hid = _relu(_bdot(what, pm_w1_ref[...]) + pm_b1_ref[...])
            zt = _bdot(hid, zm_w_ref[...]) + zm_b_ref[...]                     # (Bs, Z)

            # ---- phi_z with the [what | zt] concat split into two aligned matmuls ----
            pre = _bdot(what, pz_w1a_ref[...]) + _bdot(zt, pz_w1b_ref[...]) + pz_b1_ref[...]
            fuse = _bdot(_relu(pre), pz_w2_ref[...]) + pz_b2_ref[...]
            pe_t = pe_w_ref[pl.ds(t, 1), :]                                    # (1, Hw)
            wt_new = _layernorm(fuse + pe_t, g_w_ref[...], b_w_ref[...])       # (Bs, Hw)

            wseq_buf[pl.ds(t, 1), :, :] = wt_new.astype(jnp.bfloat16)[None, :, :]
            return wt_new

        if T <= 16:
            # Full unroll: straight-line trace lets the LLO scheduler overlap MXU pushes,
            # VPU/EUP work and slab writes across adjacent recurrence steps.
            wt = jnp.zeros((Bs, Hw), jnp.float32)
            for t in range(T):
                wt = step(t, wt)
        else:
            # TODO(synk): partial unroll (2-4) for long T once fori_loop unrolling of
            # ref-mutating bodies is exercised on this toolchain.
            _ = lax.fori_loop(0, T, step, jnp.zeros((Bs, Hw), jnp.float32))

        # ---- phi_w over the whole w-sequence: one batched matmul, one writeback ----
        wseq = wseq_buf[...].reshape(T * Bs, Hw)
        xp = _bdot(_relu(_bdot(wseq, pw_w1_ref[...]) + pw_b1_ref[...]),
                   pw_w2_ref[...]) + pw_b2_ref[...]
        # TODO(synk): at production sizes (Bs*LOC >= 128) emit the output as (T, Bs*LOC)
        # and reshape in the wrapper so the final store is lane-dense.
        xpred_ref[...] = xp.reshape(T, Bs, LOC)

    return kernel


# ----------------------------- full forward (glue + kernels) -----------------------------
def probtran_forward(params, mask, vis_obs, traj_obs):
    B, T = mask.shape
    H = params['h_dim']
    Hw = H // 2
    Z = params['z_dim']
    LOC = params['loc_dim']

    # pad batch to a multiple of 8 so matmul M fills sublanes / MXU rows
    Bp = max(8, -(-B // 8) * 8)
    pad = Bp - B
    maskf = mask.astype(jnp.float32)
    if pad:
        maskf = jnp.pad(maskf, ((0, pad), (0, 0)))
        vis_obs = jnp.pad(vis_obs, ((0, pad), (0, 0), (0, 0)))
        traj_obs = jnp.pad(traj_obs, ((0, pad), (0, 0), (0, 0)))

    bf = lambda a: a.astype(jnp.bfloat16)

    x_obs = jnp.concatenate([vis_obs, traj_obs], axis=-1)        # modalities = ['rgb','loc']
    x_tm = bf(jnp.transpose(x_obs, (1, 0, 2)))                   # time-major (T, Bp, Xd) bf16

    # ---- kernel 1: kvh = LN(phi_x(x) + pe_h) @ [wk_h | wv_h]  ->  (T, Bp, 2H) bf16 ----
    wkv_h = bf(jnp.concatenate([params['wk_h'], params['wv_h']], axis=1))
    pe_h3 = params['pe_h'][:, None, :]                           # (T, 1, H) f32
    kvh = _encode(x_tm, pe_h3, bf(params['px_w1']), params['px_b1'],
                  bf(params['px_w2']), params['px_b2'],
                  params['g_h'], params['b_h'], wkv_h)

    # ---- wrapper-side algebraic folds (done in f32, then cast to bf16) ----
    wq_w = bf(params['wq_w'] * ((Hw // NUM_HEADS) ** -0.5))      # fold qk scale into wq
    wq_h = bf(params['wq_h'] * ((H // NUM_HEADS) ** -0.5))
    wkv_w = bf(jnp.concatenate([params['wk_w'], params['wv_w']], axis=1))
    zm_w_f = bf(params['pm_w2'] @ params['zm_w'])                # prior_mean into prior_mlp
    zm_b_f = params['pm_b2'] @ params['zm_w'] + params['zm_b']
    pz_w1a = bf(params['pz_w1'][:2 * H])                         # split the [what|zt] concat
    pz_w1b = bf(params['pz_w1'][2 * H:])

    mask_tb3 = jnp.transpose(maskf)[:, :, None]                  # (T, Bp, 1)

    # ---- kernel 2: sequential recurrence, batch-sharded across v7x's two TCs ----
    nshard = 2 if (Bp % 16 == 0) else 1                          # keep Bs a multiple of 8
    Bs = Bp // nshard

    kernel = _make_recurrence_kernel(Bs, T, H, Z, LOC)
    ins = (mask_tb3, kvh, params['pe_w'],
           wq_w, wkv_w, bf(params['wp_w']), params['bp_w'],
           params['g_wb'], params['b_wb'],
           wq_h, bf(params['wp_h']), params['bp_h'],
           params['g_wh'], params['b_wh'],
           bf(params['pm_w1']), params['pm_b1'], zm_w_f, zm_b_f,
           pz_w1a, pz_w1b, params['pz_b1'], bf(params['pz_w2']), params['pz_b2'],
           params['g_w'], params['b_w'],
           bf(params['pw_w1']), params['pw_b1'], bf(params['pw_w2']), params['pw_b2'])

    sharded = {0: pl.BlockSpec((T, Bs, 1), lambda s: (0, s, 0)),
               1: pl.BlockSpec((T, Bs, 2 * H), lambda s: (0, s, 0))}
    in_specs = [sharded.get(i, _full_spec(a.shape)) for i, a in enumerate(ins)]

    # TODO(synk): for long T on v7x (64 MiB VMEM) stream kvh in T-chunks via a manual
    # double-buffer over memory_space=pl.ANY instead of keeping it fully resident.
    xpred_tb = pl.pallas_call(
        kernel,
        out_shape=jax.ShapeDtypeStruct((T, Bp, LOC), jnp.float32),
        grid_spec=pltpu.PrefetchScalarGridSpec(
            num_scalar_prefetch=0,
            grid=(nshard,),
            in_specs=in_specs,
            out_specs=pl.BlockSpec((T, Bs, LOC), lambda s: (0, s, 0)),
            scratch_shapes=[pltpu.VMEM((T, Bs, 2 * Hw), jnp.bfloat16),   # projected K|V of w
                            pltpu.VMEM((T, Bs, Hw), jnp.bfloat16)],      # raw w_1..w_T
        ),
        compiler_params=pltpu.CompilerParams(
            dimension_semantics=("parallel",),
            vmem_limit_bytes=64 * 1024 * 1024),
    )(*ins)

    x_pred = jnp.transpose(xpred_tb, (1, 0, 2))[:B]               # (B, T, LOC)
    return x_pred, {}


# ----------------------------- pure-JAX reference (for verification) -----------------------------
def reference_forward(params, mask, vis_obs, traj_obs):
    B, T = mask.shape
    H = params['h_dim']
    Hw = H // 2

    def lin(x, w, b):
        return x @ w + b

    def mha(q, kv, m, wq, wk, wv, wp, bp):
        Bq, Nq, C = q.shape
        L = kv.shape[1]
        hd = C // NUM_HEADS
        qp = (q @ wq).reshape(Bq, Nq, NUM_HEADS, hd).transpose(0, 2, 1, 3)
        kp = (kv @ wk).reshape(Bq, L, NUM_HEADS, hd).transpose(0, 2, 1, 3)
        vp = (kv @ wv).reshape(Bq, L, NUM_HEADS, hd).transpose(0, 2, 1, 3)
        sc = jnp.einsum('bhqd,bhkd->bhqk', qp, kp) * (hd ** -0.5)
        sc = jnp.where(m[:, None, None, :] > 0.5, sc, NEG)
        p = jax.nn.softmax(sc, axis=-1)
        o = jnp.einsum('bhqk,bhkd->bhqd', p, vp).transpose(0, 2, 1, 3).reshape(Bq, Nq, C)
        return o @ wp + bp

    x_obs = jnp.concatenate([vis_obs, traj_obs], axis=-1)
    h = lin(jax.nn.relu(lin(x_obs, params['px_w1'], params['px_b1'])),
            params['px_w2'], params['px_b2'])
    h = _layernorm(h + params['pe_h'][None, :, :], params['g_h'], params['b_h'])

    wt = jnp.zeros((B, 1, Hw), jnp.float32)
    w_accum = [wt]
    for t in range(T):
        kv_w = jnp.concatenate(w_accum, axis=1)
        aw = mha(wt, kv_w, mask[:, :t + 1], params['wq_w'], params['wk_w'],
                 params['wv_w'], params['wp_w'], params['bp_w'])
        wbar = _layernorm(jnp.concatenate([wt, aw], axis=-1), params['g_wb'], params['b_wb'])
        ah = mha(wbar, h, mask, params['wq_h'], params['wk_h'],
                 params['wv_h'], params['wp_h'], params['bp_h'])
        what = _layernorm(jnp.concatenate([wbar, ah], axis=-1), params['g_wh'], params['b_wh'])
        prior = lin(jax.nn.relu(lin(what, params['pm_w1'], params['pm_b1'])),
                    params['pm_w2'], params['pm_b2'])
        zt = lin(prior, params['zm_w'], params['zm_b'])
        fuse = lin(jax.nn.relu(lin(jnp.concatenate([what, zt], axis=-1),
                                   params['pz_w1'], params['pz_b1'])),
                   params['pz_w2'], params['pz_b2'])
        wt = _layernorm(fuse + params['pe_w'][None, t:t + 1, :], params['g_w'], params['b_w'])
        w_accum.append(wt)
    w_seq = jnp.concatenate(w_accum[1:], axis=1)
    x_pred = lin(jax.nn.relu(lin(w_seq, params['pw_w1'], params['pw_b1'])),
                 params['pw_w2'], params['pw_b2'])
    return x_pred


# ----------------------------- deterministic parameter init -----------------------------
def _sinusoid_pe(max_len, d):
    pos = np.arange(max_len, dtype=np.float32)[:, None]
    div = np.exp(np.arange(0, d, 2, dtype=np.float32) * (-np.log(10000.0) / d))
    pe = np.zeros((max_len, d), np.float32)
    pe[:, 0::2] = np.sin(pos * div)
    pe[:, 1::2] = np.cos(pos * div)
    return jnp.asarray(pe)


def init_params(key, vis_dim, loc_dim, h_dim, z_dim, seq_len):
    H, Hw, Z, LOC = h_dim, h_dim // 2, z_dim, loc_dim
    x_dim = vis_dim + loc_dim
    keys = iter(jax.random.split(key, 64))

    def linear(fan_in, fan_out, bias=True):
        bound = 1.0 / np.sqrt(fan_in)
        w = jax.random.uniform(next(keys), (fan_in, fan_out), jnp.float32, -bound, bound)
        if not bias:
            return w
        b = jax.random.uniform(next(keys), (1, fan_out), jnp.float32, -bound, bound)
        return w, b

    p = {'h_dim': H, 'z_dim': Z, 'loc_dim': LOC}
    p['px_w1'], p['px_b1'] = linear(x_dim, H)
    p['px_w2'], p['px_b2'] = linear(H, H)
    p['pe_h'] = _sinusoid_pe(seq_len, H)
    p['g_h'], p['b_h'] = jnp.ones((1, H)), jnp.zeros((1, H))
    # attn_w (dim H//2, no qkv bias)
    p['wq_w'] = linear(Hw, Hw, bias=False)
    p['wk_w'] = linear(Hw, Hw, bias=False)
    p['wv_w'] = linear(Hw, Hw, bias=False)
    p['wp_w'], p['bp_w'] = linear(Hw, Hw)
    p['g_wb'], p['b_wb'] = jnp.ones((1, H)), jnp.zeros((1, H))
    # attn_h (dim H, no qkv bias)
    p['wq_h'] = linear(H, H, bias=False)
    p['wk_h'] = linear(H, H, bias=False)
    p['wv_h'] = linear(H, H, bias=False)
    p['wp_h'], p['bp_h'] = linear(H, H)
    p['g_wh'], p['b_wh'] = jnp.ones((1, 2 * H)), jnp.zeros((1, 2 * H))
    # prior_mlp / prior_mean
    p['pm_w1'], p['pm_b1'] = linear(2 * H, H)
    p['pm_w2'], p['pm_b2'] = linear(H, H)
    p['zm_w'], p['zm_b'] = linear(H, Z)
    # phi_z
    p['pz_w1'], p['pz_b1'] = linear(2 * H + Z, H)
    p['pz_w2'], p['pz_b2'] = linear(H, Hw)
    p['pe_w'] = _sinusoid_pe(seq_len, Hw)
    p['g_w'], p['b_w'] = jnp.ones((1, Hw)), jnp.zeros((1, Hw))
    # phi_w (pred_link=False)
    p['pw_w1'], p['pw_b1'] = linear(Hw, LOC)
    p['pw_w2'], p['pw_b2'] = linear(LOC, LOC)
    return p


# ----------------------------- main -----------------------------
if __name__ == "__main__":
    B, T = 2, 8            # batch (= B*N in the module), seq_len
    VIS, LOC = 12, 4       # vis_dim, loc_dim  -> x_dim = 16
    H, Z = 64, 16          # h_dim, z_dim (num_heads=8 divides H and H//2)

    key = jax.random.PRNGKey(0)
    kp, kvis, ktraj, km = jax.random.split(key, 4)
    params = init_params(kp, VIS, LOC, H, Z, T)

    vis_obs = jax.random.normal(kvis, (B, T, VIS), jnp.float32)
    traj_obs = jax.random.normal(ktraj, (B, T, LOC), jnp.float32)
    # observation mask: keep t=0 observed so no real attention row is fully masked
    mask_rest = (jax.random.uniform(km, (B, T - 1)) > 0.3).astype(jnp.float32)
    mask = jnp.concatenate([jnp.ones((B, 1), jnp.float32), mask_rest], axis=1)

    x_pred, aux = probtran_forward(params, mask, vis_obs, traj_obs)
    x_pred = jax.block_until_ready(x_pred)

    assert x_pred.shape == (B, T, LOC)
    assert bool(jnp.all(jnp.isfinite(x_pred)))

    # bf16 MXU operands (f32 accumulation) vs the f32 reference put the expected max
    # deviation at ~1e-2 after T recurrence steps; 6e-2 gives comfortable margin.
    ref = reference_forward(params, mask, vis_obs, traj_obs)
    err = float(jnp.max(jnp.abs(x_pred - ref)))
    if err > 6e-2:
        raise AssertionError(f"Pallas result mismatch vs reference, max abs err = {err}")

    print("KERNEL_OK")
</pallas_src>

<mosaic_0001>
module attributes {stable_mosaic.version = 11 : i64} {
  func.func @_encode_kernel(%arg0: i32, %arg1: memref<4x8x16xbf16, #tpu.memory_space<vmem>>, %arg2: memref<4x1x64xf32, #tpu.memory_space<vmem>>, %arg3: memref<16x64xbf16, #tpu.memory_space<vmem>>, %arg4: memref<1x64xf32, #tpu.memory_space<vmem>>, %arg5: memref<64x64xbf16, #tpu.memory_space<vmem>>, %arg6: memref<1x64xf32, #tpu.memory_space<vmem>>, %arg7: memref<1x64xf32, #tpu.memory_space<vmem>>, %arg8: memref<1x64xf32, #tpu.memory_space<vmem>>, %arg9: memref<64x128xbf16, #tpu.memory_space<vmem>>, %arg10: memref<4x8x128xbf16, #tpu.memory_space<vmem>>) attributes {dimension_semantics = [#tpu.dimension_semantics<parallel>], iteration_bounds = array<i64: 2>, scalar_prefetch = 0 : i64, scratch_operands = 0 : i64, tpu.core_type = #tpu.core_type<tc>, window_params = [{transform_indices = @transform_0, window_bounds = array<i64: 4, 8, 16>}, {transform_indices = @transform_1, window_bounds = array<i64: 4, 1, 64>}, {pipeline_mode = #tpu.pipeline_mode<synchronous>, transform_indices = @transform_2, window_bounds = array<i64: 16, 64>}, {pipeline_mode = #tpu.pipeline_mode<synchronous>, transform_indices = @transform_3, window_bounds = array<i64: 1, 64>}, {pipeline_mode = #tpu.pipeline_mode<synchronous>, transform_indices = @transform_4, window_bounds = array<i64: 64, 64>}, {pipeline_mode = #tpu.pipeline_mode<synchronous>, transform_indices = @transform_5, window_bounds = array<i64: 1, 64>}, {pipeline_mode = #tpu.pipeline_mode<synchronous>, transform_indices = @transform_6, window_bounds = array<i64: 1, 64>}, {pipeline_mode = #tpu.pipeline_mode<synchronous>, transform_indices = @transform_7, window_bounds = array<i64: 1, 64>}, {pipeline_mode = #tpu.pipeline_mode<synchronous>, transform_indices = @transform_8, window_bounds = array<i64: 64, 128>}, {transform_indices = @transform_9, window_bounds = array<i64: 4, 8, 128>}]} {
    %c0 = arith.constant 0 : index
    %c0_0 = arith.constant 0 : index
    %c0_1 = arith.constant 0 : index
    %0 = vector.load %arg1[%c0, %c0_0, %c0_1] : memref<4x8x16xbf16, #tpu.memory_space<vmem>>, vector<4x8x16xbf16>
    %1 = vector.shape_cast %0 : vector<4x8x16xbf16> to vector<32x16xbf16>
    %c0_2 = arith.constant 0 : index
    %c0_3 = arith.constant 0 : index
    %2 = vector.load %arg3[%c0_2, %c0_3] : memref<16x64xbf16, #tpu.memory_space<vmem>>, vector<16x64xbf16>
    %cst = arith.constant dense<0.000000e+00> : vector<32x64xf32>
    %3 = tpu.matmul %1, %2, %cst {dimension_numbers = #tpu.dot_dimension_numbers<[1], [0], [0], [1], [0, 0, 1, 1], [], []>} : vector<32x16xbf16>, vector<16x64xbf16>, vector<32x64xf32> -> vector<32x64xf32>
    %c0_4 = arith.constant 0 : index
    %c0_5 = arith.constant 0 : index
    %4 = vector.load %arg4[%c0_4, %c0_5] : memref<1x64xf32, #tpu.memory_space<vmem>>, vector<1x64xf32>
    %5 = vector.broadcast %4 : vector<1x64xf32> to vector<32x64xf32>
    %6 = arith.addf %3, %5 : vector<32x64xf32>
    %cst_6 = arith.constant 0.000000e+00 : f32
    %7 = vector.broadcast %cst_6 : f32 to vector<32x64xf32>
    %8 = arith.maximumf %6, %7 : vector<32x64xf32>
    %c0_7 = arith.constant 0 : index
    %c0_8 = arith.constant 0 : index
    %9 = vector.load %arg5[%c0_7, %c0_8] : memref<64x64xbf16, #tpu.memory_space<vmem>>, vector<64x64xbf16>
    %10 = arith.truncf %8 : vector<32x64xf32> to vector<32x64xbf16>
    %cst_9 = arith.constant dense<0.000000e+00> : vector<32x64xf32>
    %11 = tpu.matmul %10, %9, %cst_9 {dimension_numbers = #tpu.dot_dimension_numbers<[1], [0], [0], [1], [0, 0, 1, 1], [], []>} : vector<32x64xbf16>, vector<64x64xbf16>, vector<32x64xf32> -> vector<32x64xf32>
    %c0_10 = arith.constant 0 : index
    %c0_11 = arith.constant 0 : index
    %12 = vector.load %arg6[%c0_10, %c0_11] : memref<1x64xf32, #tpu.memory_space<vmem>>, vector<1x64xf32>
    %13 = vector.broadcast %12 : vector<1x64xf32> to vector<32x64xf32>
    %14 = arith.addf %11, %13 : vector<32x64xf32>
    %15 = vector.shape_cast %14 : vector<32x64xf32> to vector<4x8x64xf32>
    %c0_12 = arith.constant 0 : index
    %c0_13 = arith.constant 0 : index
    %c0_14 = arith.constant 0 : index
    %16 = vector.load %arg2[%c0_12, %c0_13, %c0_14] : memref<4x1x64xf32, #tpu.memory_space<vmem>>, vector<4x1x64xf32>
    %17 = vector.broadcast %16 : vector<4x1x64xf32> to vector<4x8x64xf32>
    %18 = arith.addf %15, %17 : vector<4x8x64xf32>
    %c0_15 = arith.constant 0 : index
    %c0_16 = arith.constant 0 : index
    %19 = vector.load %arg7[%c0_15, %c0_16] : memref<1x64xf32, #tpu.memory_space<vmem>>, vector<1x64xf32>
    %c0_17 = arith.constant 0 : index
    %c0_18 = arith.constant 0 : index
    %20 = vector.load %arg8[%c0_17, %c0_18] : memref<1x64xf32, #tpu.memory_space<vmem>>, vector<1x64xf32>
    %cst_19 = arith.constant dense<0.000000e+00> : vector<4x8xf32>
    %21 = vector.multi_reduction <add>, %18, %cst_19 [2] : vector<4x8x64xf32> to vector<4x8xf32>
    %22 = vector.shape_cast %21 : vector<4x8xf32> to vector<4x8x1xf32>
    %cst_20 = arith.constant 6.400000e+01 : f32
    %23 = vector.broadcast %cst_20 : f32 to vector<4x8x1xf32>
    %24 = arith.divf %22, %23 : vector<4x8x1xf32>
    %25 = vector.broadcast %24 : vector<4x8x1xf32> to vector<4x8x64xf32>
    %26 = arith.subf %18, %25 : vector<4x8x64xf32>
    %27 = arith.mulf %26, %26 : vector<4x8x64xf32>
    %cst_21 = arith.constant dense<0.000000e+00> : vector<4x8xf32>
    %28 = vector.multi_reduction <add>, %27, %cst_21 [2] : vector<4x8x64xf32> to vector<4x8xf32>
    %29 = vector.shape_cast %28 : vector<4x8xf32> to vector<4x8x1xf32>
    %cst_22 = arith.constant 6.400000e+01 : f32
    %30 = vector.broadcast %cst_22 : f32 to vector<4x8x1xf32>
    %31 = arith.divf %29, %30 : vector<4x8x1xf32>
    %cst_23 = arith.constant 9.99999974E-6 : f32
    %32 = vector.broadcast %cst_23 : f32 to vector<4x8x1xf32>
    %33 = arith.addf %31, %32 : vector<4x8x1xf32>
    %34 = math.rsqrt %33 : vector<4x8x1xf32>
    %35 = vector.broadcast %34 : vector<4x8x1xf32> to vector<4x8x64xf32>
    %36 = arith.mulf %26, %35 : vector<4x8x64xf32>
    %37 = vector.shape_cast %19 : vector<1x64xf32> to vector<1x1x64xf32>
    %38 = vector.broadcast %37 : vector<1x1x64xf32> to vector<4x8x64xf32>
    %39 = arith.mulf %36, %38 : vector<4x8x64xf32>
    %40 = vector.shape_cast %20 : vector<1x64xf32> to vector<1x1x64xf32>
    %41 = vector.broadcast %40 : vector<1x1x64xf32> to vector<4x8x64xf32>
    %42 = arith.addf %39, %41 : vector<4x8x64xf32>
    %43 = vector.shape_cast %42 : vector<4x8x64xf32> to vector<32x64xf32>
    %c0_24 = arith.constant 0 : index
    %c0_25 = arith.constant 0 : index
    %44 = vector.load %arg9[%c0_24, %c0_25] : memref<64x128xbf16, #tpu.memory_space<vmem>>, vector<64x128xbf16>
    %45 = arith.truncf %43 : vector<32x64xf32> to vector<32x64xbf16>
    %cst_26 = arith.constant dense<0.000000e+00> : vector<32x128xf32>
    %46 = tpu.matmul %45, %44, %cst_26 {dimension_numbers = #tpu.dot_dimension_numbers<[1], [0], [0], [1], [0, 0, 1, 1], [], []>} : vector<32x64xbf16>, vector<64x128xbf16>, vector<32x128xf32> -> vector<32x128xf32>
    %47 = vector.shape_cast %46 : vector<32x128xf32> to vector<4x8x128xf32>
    %48 = arith.truncf %47 : vector<4x8x128xf32> to vector<4x8x128xbf16>
    %c0_27 = arith.constant 0 : index
    %c0_28 = arith.constant 0 : index
    %c0_29 = arith.constant 0 : index
    %49 = vector.load %arg10[%c0_27, %c0_28, %c0_29] : memref<4x8x128xbf16, #tpu.memory_space<vmem>>, vector<4x8x128xbf16>
    tpu.vector_store %arg10[%c0_27, %c0_28, %c0_29], %48 {strides = array<i32>} : memref<4x8x128xbf16, #tpu.memory_space<vmem>>, vector<4x8x128xbf16>,
    return
  }
  func.func @transform_0(%arg0: i32) -> (i32, i32, i32) {
    %c0_i32 = arith.constant 0 : i32
    %c0_i32_0 = arith.constant 0 : i32
    %c0_i32_1 = arith.constant 0 : i32
    return %arg0, %c0_i32, %c0_i32_0 : i32, i32, i32
  }
  func.func @transform_1(%arg0: i32) -> (i32, i32, i32) {
    %c0_i32 = arith.constant 0 : i32
    %c0_i32_0 = arith.constant 0 : i32
    %c0_i32_1 = arith.constant 0 : i32
    return %arg0, %c0_i32, %c0_i32_0 : i32, i32, i32
  }
  func.func @transform_2(%arg0: i32) -> (i32, i32) {
    %c0_i32 = arith.constant 0 : i32
    %c0_i32_0 = arith.constant 0 : i32
    %c0_i32_1 = arith.constant 0 : i32
    return %c0_i32, %c0_i32_0 : i32, i32
  }
  func.func @transform_3(%arg0: i32) -> (i32, i32) {
    %c0_i32 = arith.constant 0 : i32
    %c0_i32_0 = arith.constant 0 : i32
    %c0_i32_1 = arith.constant 0 : i32
    return %c0_i32, %c0_i32_0 : i32, i32
  }
  func.func @transform_4(%arg0: i32) -> (i32, i32) {
    %c0_i32 = arith.constant 0 : i32
    %c0_i32_0 = arith.constant 0 : i32
    %c0_i32_1 = arith.constant 0 : i32
    return %c0_i32, %c0_i32_0 : i32, i32
  }
  func.func @transform_5(%arg0: i32) -> (i32, i32) {
    %c0_i32 = arith.constant 0 : i32
    %c0_i32_0 = arith.constant 0 : i32
    %c0_i32_1 = arith.constant 0 : i32
    return %c0_i32, %c0_i32_0 : i32, i32
  }
  func.func @transform_6(%arg0: i32) -> (i32, i32) {
    %c0_i32 = arith.constant 0 : i32
    %c0_i32_0 = arith.constant 0 : i32
    %c0_i32_1 = arith.constant 0 : i32
    return %c0_i32, %c0_i32_0 : i32, i32
  }
  func.func @transform_7(%arg0: i32) -> (i32, i32) {
    %c0_i32 = arith.constant 0 : i32
    %c0_i32_0 = arith.constant 0 : i32
    %c0_i32_1 = arith.constant 0 : i32
    return %c0_i32, %c0_i32_0 : i32, i32
  }
  func.func @transform_8(%arg0: i32) -> (i32, i32) {
    %c0_i32 = arith.constant 0 : i32
    %c0_i32_0 = arith.constant 0 : i32
    %c0_i32_1 = arith.constant 0 : i32
    return %c0_i32, %c0_i32_0 : i32, i32
  }
  func.func @transform_9(%arg0: i32) -> (i32, i32, i32) {
    %c0_i32 = arith.constant 0 : i32
    %c0_i32_0 = arith.constant 0 : i32
    %c0_i32_1 = arith.constant 0 : i32
    return %arg0, %c0_i32, %c0_i32_0 : i32, i32, i32
  }
}

</mosaic_0001>

<bundles_post_ra>
// kernel: tpu_custom_call.1
= control target key start
LH: loop header
LB: loop body
LE: loop exit
PB: predicated region body
PF: predicated region fallthrough
CT: control target
= control target key end

     0   :  { %s1753_s0 = inlined_call_operand.hbm [shape: bf16[8,8,16], index: 0, kind: input, shape index: {}]   ;;  %s1754_s1 = inlined_call_operand.hbm [shape: f32[8,1,64], index: 1, kind: input, shape index: {}]   ;;  %s1755_s2 = inlined_call_operand.hbm [shape: bf16[16,64], index: 2, kind: input, shape index: {}]   ;;  %s1756_s3 = inlined_call_operand.vmem [shape: f32[1,64], index: 3, kind: input, shape index: {}]   ;;  %s1757_s4 = inlined_call_operand.hbm [shape: bf16[64,64], index: 4, kind: input, shape index: {}]   ;;  %s1758_s5 = inlined_call_operand.vmem [shape: f32[1,64], index: 5, kind: input, shape index: {}]   ;;  %s1759_s6 = inlined_call_operand.vmem [shape: f32[1,64], index: 6, kind: input, shape index: {}]   ;;  %s1760_s7 = inlined_call_operand.vmem [shape: f32[1,64], index: 7, kind: input, shape index: {}]   ;;  %s1761_s8 = inlined_call_operand.hbm [shape: bf16[64,128], index: 8, kind: input, shape index: {}]   ;;  %s1762_s9 = inlined_call_operand.hbm [shape: bf16[8,8,128], index: 9, kind: output, shape index: {}]  }
   0x1   :  { %1771 = sst [smem:[#allocation20_spill]] %s1753_s0 }
   0x2   :  { %1772 = sst [smem:[#allocation21_spill]] %s1755_s2 }
   0x3   :  { %1773 = sst [smem:[#allocation22_spill]] %s1757_s4 }
   0x4   :  { %1774 = sst [smem:[#allocation23_spill]] %s1761_s8 }
   0x5   :  { %14 = vsyncpa [#allocation3], 0 }
   0x6   :  { %16 = vsyncpa [#allocation3 + $0x1], 0 }
   0x7   :  { %17 = vsyncpa [#allocation6], 0 }
   0x8   :  { %19 = vsyncpa [#allocation6 + $0x1], 0 }
   0x9   :  { %20 = vsyncpa [#allocation9], 0 }
   0xa   :  { %21 = vsyncpa [#allocation4], 0 }
   0xb   :  { %23 = vsyncpa [#allocation4 + $0x1], 0  ;;  %s1455_s30 = smov 0   ;;  %s1457_s10 = smov 0  }
   0xc   :  { %s1459_s11 = smov 0   ;;  %s1461_s12 = smov 0  }
   0xd LB: > { %1775 = sst [smem:[#allocation17_spill]] %s1387_s11  ;;  %s1476_s13 = sadd.s32 4294967295, %s1391_s12   ;;  %s1391_s12 = sphi %s1461_s12, %s1800_s12   ;;  %s1387_s11 = sphi %s1459_s11, %s1802_s11   ;;  %s1383_s10 = sphi %s1457_s10, %s1804_s10   ;;  %s1379_s30 = sphi %s1455_s30, %s1803_s30  }
   0xe   : > { %s966_s14 = sadd.s32 4294967294, %s1391_s12   ;;  %p49_p0 = scmp.ne.s32.totalorder %s1383_s10, %s1379_s30 }
   0xf   : > { %p1763_p1 = scmp.eq.s32.totalorder %s1476_s13, 0  ;;  %p246_p2 = scmp.eq.s32.totalorder %s1476_s13, 1 }
  0x10   : > { %p252_p3 = scmp.eq.s32.totalorder %s966_s14, 1  ;;  %p967_p5 = scmp.ge.s32.totalorder %s1391_s12, 1 }
  0x11   : > { %p1485_p4 = por %p1763_p1, %p49_p0  ;;  %p259_p7 = scmp.lt.s32.totalorder %s1391_s12, 3 }
  0x12   : > { %p1490_p6 = por %p252_p3, %p49_p0  ;;  %s1393_s18 = smov [#allocation7]  }
  0x13   : > { %s1776_s15 = scalar_select %p1485_p4, 1, 0 }
  0x14   : > { %s1777_s16 = scalar_select %p1490_p6, 1, 0 }
  0x15   : > { %p1495_p8 = pnand %p967_p5, %p259_p7  ;;  %s271_s19 = sshll.u32 %s1393_s18, 4  ;;  %s272_s19 = int_to_ptr.vmem [resolvable:$true] %s271_s19 }
  0x16   : > { %s1394_s21 = smov [#allocation8]   ;;  %s1395_s23 = smov [#allocation10]  }
  0x17   : > { %p1092_p9 = pneg %p1495_p8  ;;  %s287_s22 = sshll.u32 %s1394_s21, 4  ;;  %s288_s22 = int_to_ptr.vmem [resolvable:$true] %s287_s22 }
  0x18   : > { %s309_s24 = sshll.u32 %s1395_s23, 4  ;;  %s1192_s25 = scalar_lea.vmem %s272_s19, 128  ;;  %s310_s24 = int_to_ptr.vmem [resolvable:$true] %s309_s24 }
  0x19   : > { %p1504_p11 = pnand %p1092_p9, %p1763_p1  ;;  %p1193_p13 = scmp.ne.s32.totalorder %s272_s19, %s1192_s25 }
  0x1a   : > { %p1200_p5 = scmp.lt.s32.totalorder %s272_s19, %s272_s19  ;;  %p1201_p7 = scmp.lt.s32.totalorder %s1192_s25, %s1192_s25 }
  0x1b   : > { %p1183_p12 = pneg %p1504_p11 }
  0x1c   : > { %p1202_p9 = por %p1201_p7, %p1200_p5 }
  0x1d   : > { %p1195_p0 = pnand %p1193_p13, %p1183_p12 }
  0x1f   : > { %p1196_p3 = pneg %p1195_p0 }
  0x21   : > { %p1203_p10 = pnand %p1202_p9, %p1196_p3 }
  0x23   : > { %1206 = shalt.err (!%p1203_p10)
}
  0x24   : > { %s1764_s26 = smov 64   ;;  %s1765_s27 = smov 4  }
  0x25   : > { %s1780_s2 = sld [smem:[#allocation21_spill]]  ;;  %s1218_s14 = scalar_lea.vmem %s288_s22, 512 }
  0x26   : > { %p1219_p13 = scmp.ne.s32.totalorder %s288_s22, %s1218_s14  ;;  %p1226_p3 = scmp.lt.s32.totalorder %s288_s22, %s288_s22 }
  0x27   : > { %p1227_p10 = scmp.lt.s32.totalorder %s1218_s14, %s1218_s14 }
  0x28   : > { %p1221_p0 = pnand %p1219_p13, %p1183_p12 }
  0x29   : > { %p1228_p7 = por %p1227_p10, %p1226_p3 }
  0x2a   : > { %p1222_p5 = pneg %p1221_p0 }
  0x2b   : > { %1095 = dma.hbm_to_vmem [thread:$0]  (!%p1504_p11), %s1780_s2, 128, %s272_s19, [#allocation6], %s1764_s26, %s1764_s26, %s1765_s27  }
  0x2c   : > { %p1229_p9 = pnand %p1228_p7, %p1222_p5 }
  0x2e   : > { %1232 = shalt.err (!%p1229_p9)
}
  0x2f   : > { %s1781_s4 = sld [smem:[#allocation22_spill]]  ;;  %s1244_s19 = scalar_lea.vmem %s310_s24, 512 }
  0x30   : > { %p1245_p1 = scmp.ne.s32.totalorder %s310_s24, %s1244_s19  ;;  %p1252_p3 = scmp.lt.s32.totalorder %s310_s24, %s310_s24 }
  0x31   : > { %p1253_p5 = scmp.lt.s32.totalorder %s1244_s19, %s1244_s19 }
  0x32   : > { %p1247_p13 = pnand %p1245_p1, %p1183_p12 }
  0x33   : > { %p1254_p10 = por %p1253_p5, %p1252_p3 }
  0x34   : > { %p1248_p0 = pneg %p1247_p13 }
  0x35   : > { %1098 = dma.hbm_to_vmem [thread:$0]  (!%p1504_p11), %s1781_s4, 512, %s288_s22, [#allocation9], %s1764_s26, %s1764_s26, %s1765_s27  }
  0x36   : > { %p1255_p7 = pnand %p1254_p10, %p1248_p0 }
  0x38   : > { %1258 = shalt.err (!%p1255_p7)
}
  0x39   : > { %s1782_s8 = sld [smem:[#allocation23_spill]]  ;;  %s1544_s22 = sadd.s32 1, %s1391_s12  }
  0x3a   : > { %1783 = sst [smem:[#allocation18_spill]] %s1544_s22  ;;  %s33_s20 = ssub.s32 %s1391_s12, %s1544_s22 }
  0x3b   : > { %s36_s28 = sadd.s32 1, %s1387_s11  ;;  %p34_p1 = scmp.eq.s32.totalorder %s33_s20, 0 }
  0x3c   : > { %p43_p12 = scmp.ne.s32.totalorder %s1387_s11, %s1383_s10  ;;  %p44_p9 = scmp.eq.s32.totalorder %s1391_s12, 0 }
  0x3d   : > { %p1116_p13 = scmp.lt.s32.totalorder %s1391_s12, 2  ;;  %s1563_s18 = sand.u32 1, %s1387_s11  }
  0x3e   : > { %s1554_s29 = scalar_select %p34_p1, %s1387_s11, %s36_s28  }
  0x3f   : > { %1101 = dma.hbm_to_vmem [thread:$0]  (!%p1504_p11), %s1782_s8, 512, %s310_s24, [#allocation9], %s1764_s26, %s1764_s26, %s1765_s27  }
  0x40   : > { %1784 = sst [smem:[#allocation19_spill]] %s1554_s29  ;;  %p45_p0 = por %p44_p9, %p43_p12 }
  0x41   : > { %p1558_p3 = por %p246_p2, %p43_p12  ;;  %s1015_s24 = sshll.u32 %s1391_s12, 8 }
  0x42   : > { %s972_s21 = sshll.u32 %s1563_s18, 4  ;;  %s1786_s0 = sld [smem:[#allocation20_spill]] }
  0x43   : > { %s1785_s14 = scalar_select %p1558_p3, 1, 0 }
  0x44   : > { %s327_s20 = scalar_lea.vmem [#allocation2], %s972_s21  ;;  %p1572_p2 = pnand %p1116_p13, %p45_p0 }
  0x45   : > { %s334_s28 = sshll.u32 %s327_s20, 4  ;;  %s1576_s28 = int_to_ptr.vmem [resolvable:$true] %s334_s28 }
  0x46   : > { %p1261_p5 = pneg %p1572_p2 }
  0x48   : > { %s1570_s25 = scalar_lea.hbm %s1786_s0, %s1015_s24  ;;  %s1264_s19 = scalar_lea.hbm %s1786_s0, 512 }
  0x49   : > { %s1259_s4 = scalar_lea.hbm %s1570_s25, 256  ;;  %p1265_p1 = scmp.lt.s32.totalorder %s1570_s25, %s1786_s0 }
  0x4a   : > { %p1260_p11 = scmp.ne.s32.totalorder %s1570_s25, %s1259_s4  ;;  %p1266_p12 = scmp.lt.s32.totalorder %s1264_s19, %s1259_s4 }
  0x4c   : > { %p1262_p10 = pnand %p1261_p5, %p1260_p11  ;;  %p1267_p9 = por %p1266_p12, %p1265_p1 }
  0x4e   : > { %p1263_p7 = pneg %p1262_p10 }
  0x50   : > { %p1268_p13 = pnand %p1267_p9, %p1263_p7 }
  0x52   : > { %1271 = shalt.err (!%p1268_p13)
}
  0x53   : > { %s1272_s27 = scalar_lea.vmem %s1576_s28, 256  ;;  %s1398_s24 = smov [#allocation2]  }
  0x54   : > { %p1273_p0 = scmp.ne.s32.totalorder %s1576_s28, %s1272_s27  ;;  %s1277_s21 = sshll.u32 %s1398_s24, 4  ;;  %s1278_s21 = int_to_ptr.vmem [resolvable:$false] %s1277_s21 }
  0x55   : > { %s1279_s2 = scalar_lea.vmem %s1278_s21, 512  ;;  %p1280_p6 = scmp.lt.s32.totalorder %s1576_s28, %s1278_s21 }
  0x56   : > { %p1275_p11 = pnand %p1273_p0, %p1261_p5  ;;  %p1281_p3 = scmp.lt.s32.totalorder %s1279_s2, %s1272_s27 }
  0x58   : > { %p1276_p10 = pneg %p1275_p11  ;;  %p1282_p4 = por %p1281_p3, %p1280_p6 }
  0x5a   : > { %p1283_p1 = pnand %p1282_p4, %p1276_p10 }
  0x5c   : > { %1286 = shalt.err (!%p1283_p1)
}
  0x5d   : > { %s1788_s4 = smov 4   ;;  %s1789_s19 = smov 64  }
  0x5e   : > { %s1790_s23 = scalar_lea.sflag [#allocation3], %s1563_s18  ;;  %s975_s20 = sshll.u32 %s1563_s18, 2 }
  0x5f   : > { %1105 = dma.hbm_to_vmem [thread:$0]  (!%p1572_p2), %s1570_s25, 256, %s1576_s28, %s1790_s23, %s1789_s19, %s1789_s19, %s1788_s4  }
  0x60   : > { %s1016_s24 = sshll.u32 %s1391_s12, 6  ;;  %s348_s0 = scalar_lea.vmem [#allocation5], %s975_s20 }
  0x61   : > { %s1614_s21 = scalar_lea.hbm %s1754_s1, %s1016_s24  ;;  %s355_s8 = sshll.u32 %s348_s0, 4  ;;  %s1616_s8 = int_to_ptr.vmem [resolvable:$true] %s355_s8 }
  0x62   : > { %s1791_s29 = sand.u32 1, %s1391_s12   ;;  %s1287_s22 = scalar_lea.hbm %s1614_s21, 64 }
  0x63   : > { %s1620_s11 = scalar_lea.sflag [#allocation6], %s1791_s29  ;;  %p1288_p4 = scmp.ne.s32.totalorder %s1614_s21, %s1287_s22 }
  0x64   : > { %s1292_s28 = scalar_lea.hbm %s1754_s1, 128  ;;  %p1293_p7 = scmp.lt.s32.totalorder %s1614_s21, %s1754_s1 }
  0x65   : > { %p1290_p6 = pnand %p1288_p4, %p1261_p5  ;;  %p1294_p12 = scmp.lt.s32.totalorder %s1292_s28, %s1287_s22 }
  0x67   : > { %p1291_p3 = pneg %p1290_p6  ;;  %p1295_p9 = por %p1294_p12, %p1293_p7 }
  0x69   : > { %p1296_p13 = pnand %p1295_p9, %p1291_p3 }
  0x6b   : > { %1299 = shalt.err (!%p1296_p13)
}
  0x6c   : > { %s1300_s0 = scalar_lea.vmem %s1616_s8, 64  ;;  %s1399_s29 = smov [#allocation5]  }
  0x6d   : > { %p1301_p0 = scmp.ne.s32.totalorder %s1616_s8, %s1300_s0  ;;  %s1305_s23 = sshll.u32 %s1399_s29, 4  ;;  %s1306_s23 = int_to_ptr.vmem [resolvable:$false] %s1305_s23 }
  0x6e   : > { %s1307_s20 = scalar_lea.vmem %s1306_s23, 128  ;;  %p1308_p1 = scmp.lt.s32.totalorder %s1616_s8, %s1306_s23 }
  0x6f   : > { %p1303_p11 = pnand %p1301_p0, %p1261_p5  ;;  %p1309_p4 = scmp.lt.s32.totalorder %s1307_s20, %s1300_s0 }
  0x71   : > { %p1304_p10 = pneg %p1303_p11  ;;  %p1310_p6 = por %p1309_p4, %p1308_p1 }
  0x73   : > { %p1311_p7 = pnand %p1310_p6, %p1304_p10 }
  0x75   : > { %1314 = shalt.err (!%p1311_p7)
}
  0x76   : > { %s1400_s22 = smov 16   ;;  %s1401_s24 = smov 1  }
  0x77   : > { %1108 = dma.hbm_to_vmem [thread:$0]  (!%p1572_p2), %s1614_s21, 64, %s1616_s8, %s1620_s11, %s1400_s22, %s1400_s22, %s1401_s24  }
  0x78   : > { %367 = sbr.rel (%p1495_p8) target bundleno = 1079 (0x437), region = 56  ;;  %s1648_s2 = sand.u32 (!%p1495_p8), 1, %s1383_s10  }
  0x79   : > { %s979_s27 = sshll.u32 (!%p1495_p8), %s1648_s2, 4  ;;  %s370_s18 = scalar_lea.sflag (!%p1495_p8), [#allocation3], %s1648_s2 }
  0x7a   : > { %s373_s25 = scalar_lea.vmem (!%p1495_p8), [#allocation2], %s979_s27  ;;  %p1792_p5 = scmp.ne.s32.totalorder (!%p1495_p8), %s1776_s15, 0 }
  0x7d   : > { %1358 = dma.done.wait (%p1792_p5), %s370_s18, 256  }
  0x7e   : > { %1360 = vsyncadd (%p1792_p5), %s370_s18, 4294967040  ;;  %s378_s8 = sand.u32 1, %s1476_s13   ;;  %s980_s11 = sshll.u32 %s1648_s2, 2 }
  0x7f   : > { %s379_s17 = scalar_lea.sflag [#allocation6], %s378_s8  ;;  %s1660_s26 = scalar_lea.vmem [#allocation5], %s980_s11 }
  0x80   : > { %1362 = dma.done.wait (%p1792_p5), %s379_s17, 64  }
  0x81   : > { %1364 = vsyncadd (%p1792_p5), %s379_s17, 4294967232  ;;  %p1793_p8 = scmp.eq.s32.totalorder %s1476_s13, 0 }
  0x83   : > { %1366 = dma.done.wait (%p1793_p8), [#allocation6], 128   ;;  %p1794_p2 = pmov %p1793_p8 }
  0x85   : > { %1368 = vsyncadd (%p1794_p2), [#allocation6], 4294967168  ;;  %p1795_p3 = pmov %p1794_p2 }
  0x86   : > { %p1796_p12 = pmov %p1794_p2 }
  0x87   : > { %1370 = dma.done.wait (%p1795_p3), [#allocation9], 1024  }
  0x88   : > { %1372 = vsyncadd (%p1796_p12), [#allocation9], 4294966272  ;;  %v1162_v0 = vld [vmem:[#allocation7] sm:$0xff]   ;;  %vm467_vm0 = vcmask 130048   ;;  %v1163_v1 = vld [vmem:[%s373_s25] sm:$0xff]   ;;  %vm568_vm1 = vcmask 523264  }
  0x89   : > { %1044 = vmatprep.subr.bf16.mxu0 %v1162_v0  ;;  %v1164_v2 = vld [vmem:[%s373_s25 + $0x8] sm:$0xff]   ;;  %1046 = vmatprep.mubr.msk.bf16.mxu0 %vm467_vm0, %v1163_v1  ;;  %v1166_v4 = vld [vmem:[#allocation8 + $0x10] sm:$0xff]   ;;  %v1168_v6 = vld [vmem:[#allocation8] sm:$0xff]   ;;  %s433_s20 = scalar_lea.vmem [#allocation11], %s979_s27  ;;  %s1017_s24 = sshll.u32 %s1476_s13, 8 }
  0x8a   : > { %1045 = vmatpush3.bf16.msra.mxu0 %v1162_v0  ;;  %v1165_v3 = vld [vmem:[#allocation8 + $0x18] sm:$0xff]   ;;  %v1167_v5 = vld [vmem:[#allocation8 + $0x8] sm:$0xff]   ;;  %v985_v9 = vld [vmem:[%s1756_s3] ss:$0 sm:$0xff]  ;;  %s842_s22 = sshll.u32 %s433_s20, 4  ;;  %s1710_s8 = scalar_lea.hbm %s1762_s9, %s1017_s24  ;;  %s1705_s22 = int_to_ptr.vmem [resolvable:$true] %s842_s22 }
  0x8b   : > { %1050 = vmatprep.subr.bf16.mxu1 %v1165_v3  ;;  %v991_v22 = vld [vmem:[%s1758_s5] ss:$0 sm:$0xff]  ;;  %v1000_v24 = vld [vmem:[%s1660_s26 + $0x2] ss:$0 sm:$0xff]  ;;  %v1001_v31 = vld [vmem:[%s1660_s26 + $0x3] ss:$0 sm:$0xff] }
  0x8c   : > { %1051 = vmatpush3.bf16.msra.mxu1 %v1165_v3  ;;  %v998_v27 = vld [vmem:[%s1660_s26] ss:$0 sm:$0xff]  ;;  %v999_v36 = vld [vmem:[%s1660_s26 + $0x1] ss:$0 sm:$0xff]  ;;  %v1169_v63 = vld [vmem:[#allocation10 + $0x18] sm:$0xff]   ;;  %s829_s11 = scalar_lea.sflag [#allocation4], %s1648_s2 }
  0x8d   : > { %1047 = vmatmul.mubr.msk.bf16.vlgmr.msra.gmra.mxu0 %vm467_vm0, %v1164_v2  ;;  %1052 = vmatprep.subr.bf16.mxu1 %v1166_v4  ;;  %v1170_v0 = vld [vmem:[#allocation10 + $0x10] sm:$0xff]   ;;  %v1171_v1 = vld [vmem:[#allocation10 + $0x8] sm:$0xff]   ;;  %v1172_v2 = vld [vmem:[#allocation10] sm:$0xff]   ;;  %s1315_s27 = scalar_lea.vmem %s1705_s22, 256  ;;  %p1797_p13 = scmp.ne.s32.totalorder %s1785_s14, 0 }
  0x8e   : > { %1062 = vmatprep.subr.bf16.mxu0 %v1169_v63  ;;  %p1316_p9 = scmp.ne.s32.totalorder %s1705_s22, %s1315_s27  ;;  %s1402_s13 = smov [#allocation11]  }
  0x8f   : > { %1063 = vmatpush3.bf16.msra.mxu0 %v1169_v63  ;;  %s1319_s17 = sshll.u32 %s1402_s13, 4  ;;  %s1320_s17 = int_to_ptr.vmem [resolvable:$false] %s1319_s17 }
  0x90   : > { %1053 = vmatpush3.bf16.msra.mxu1 %v1166_v4  ;;  %1064 = vmatprep.subr.bf16.mxu0 %v1170_v0  ;;  %p1317_p0 = pnand %p1316_p9, %p1797_p13  ;;  %s1321_s26 = scalar_lea.vmem %s1320_s17, 512 }
  0x91   : > { %1054 = vmatprep.subr.bf16.mxu1 %v1167_v5  ;;  %p1322_p10 = scmp.lt.s32.totalorder %s1705_s22, %s1320_s17  ;;  %p1323_p1 = scmp.lt.s32.totalorder %s1321_s26, %s1315_s27 }
  0x92   : > { %p1318_p11 = pneg %p1317_p0 }
  0x93   : > { %1065 = vmatpush3.bf16.msra.mxu0 %v1170_v0  ;;  %p1324_p4 = por %p1323_p1, %p1322_p10 }
  0x94   : > { %1055 = vmatpush3.bf16.msra.mxu1 %v1167_v5  ;;  %1066 = vmatprep.subr.bf16.mxu0 %v1171_v1 }
  0x95   : > { %1056 = vmatprep.subr.bf16.mxu1 %v1168_v6  ;;  %p1325_p6 = pnand %p1324_p4, %p1318_p11 }
  0x97   : > { %1067 = vmatpush3.bf16.msra.mxu0 %v1171_v1 }
  0x98   : > { %1057 = vmatpush3.bf16.msra.mxu1 %v1168_v6  ;;  %1068 = vmatprep.subr.bf16.mxu0 %v1172_v2 }
  0x9b   : > { %1069 = vmatpush3.bf16.msra.mxu0 %v1172_v2 }
 0x14d   : > { %v1048_v7 = vpop.f32.mrf.mxu0 }
 0x14e   : > { %v517_v13 = vadd.f32 %v1048_v7, %v985_v9 }
 0x14f   : > { %v508_v8 = vpop.f32.mrf.mxu0 }
 0x150   : > { %v509_v11 = vadd.f32 %v985_v9, %v508_v8  ;;  %v525_v19 = vmax.f32 %v517_v13, 0.0 }
 0x151   : > { %v1049_v10 = vpop.f32.mrf.mxu0 }
 0x152   : > { %v520_v12 = vadd.f32 %v1049_v10, %v985_v9  ;;  %v523_v17 = vmax.f32 %v509_v11, 0.0 }
 0x153   : > { %v511_v14 = vpop.f32.mrf.mxu0 }
 0x154   : > { %v512_v15 = vadd.f32 %v985_v9, %v511_v14  ;;  %v526_v16 = vmax.f32 %v520_v12, 0.0 }
 0x156   : > { %v524_v18 = vmax.f32 %v512_v15, 0.0  ;;  %v536_v21 = vpack.c.bf16 %v526_v16, %v525_v19 }
 0x158   : > { %v535_v20 = vpack.c.bf16 %v524_v18, %v523_v17  ;;  %v1002_v17 = vld [vmem:[%s1759_s6] ss:$0 sm:$0xff] }
 0x15a   : > { %1058 = vmatprep.mubr.msk.bf16.mxu1 %vm568_vm1, %v535_v20 }
 0x15b   : > { %1059 = vmatmul.mubr.msk.bf16.vlgmr.msra.gmra.mxu1 %vm568_vm1, %v536_v21 }
 0x21b   : > { %v1060_v23 = vpop.f32.mrf.mxu1 }
 0x21c   : > { %v618_v25 = vadd.f32 %v1060_v23, %v991_v22  ;;  %v1003_v23 = vld [vmem:[%s1760_s7] ss:$0 sm:$0xff] }
 0x21d   : > { %v609_v26 = vpop.f32.mrf.mxu1 }
 0x21e   : > { %v610_v28 = vadd.f32 %v991_v22, %v609_v26  ;;  %v654_v29 = vadd.f32 %v1000_v24, %v618_v25 }
 0x21f   : > { %v1061_v30 = vpop.f32.mrf.mxu1 }
 0x220   : > { %v621_v32 = vadd.f32 %v1061_v30, %v991_v22  ;;  %v664_v33 = vsel %vm568_vm1, %v654_v29, 0.0  ;;  %v652_v34 = vadd.f32 %v998_v27, %v610_v28 }
 0x221   : > { %665 = vadd.xlane.f32.xlu1 %v664_v33  ;;  %v612_v35 = vpop.f32.mrf.mxu1 }
 0x222   : > { %v613_v37 = vadd.f32 %v991_v22, %v612_v35  ;;  %v658_v38 = vsel %vm568_vm1, %v652_v34, 0.0  ;;  %v655_v39 = vadd.f32 %v1001_v31, %v621_v32 }
 0x223   : > { %659 = vadd.xlane.f32.xlu0 %v658_v38 }
 0x224   : > { %v667_v40 = vsel %vm568_vm1, %v655_v39, 0.0  ;;  %v653_v41 = vadd.f32 %v999_v36, %v613_v37 }
 0x225   : > { %668 = vadd.xlane.f32.xlu1 %v667_v40 }
 0x226   : > { %v661_v42 = vsel %vm568_vm1, %v653_v41, 0.0 }
 0x227   : > { %662 = vadd.xlane.f32.xlu0 %v661_v42 }
 0x2aa   : > { %v666_v43 = vpop.xlane.xlu1 %665 }
 0x2ab   : > { %v673_v44 = vmul.f32 0.015625, %v666_v43 }
 0x2ac   : > { %v660_v45 = vpop.xlane.xlu0 %659 }
 0x2ad   : > { %v671_v46 = vmul.f32 0.015625, %v660_v45  ;;  %v677_v48 = vsub.f32 %v654_v29, %v673_v44 }
 0x2ae   : > { %v669_v47 = vpop.xlane.xlu1 %668 }
 0x2af   : > { %v675_v49 = vsub.f32 %v652_v34, %v671_v46  ;;  %v674_v50 = vmul.f32 0.015625, %v669_v47  ;;  %v681_v57 = vmul.f32 %v677_v48, %v677_v48 }
 0x2b0   : > { %v663_v51 = vpop.xlane.xlu0 %662 }
 0x2b1   : > { %v672_v52 = vmul.f32 0.015625, %v663_v51  ;;  %v679_v53 = vmul.f32 %v675_v49, %v675_v49  ;;  %v678_v54 = vsub.f32 %v655_v39, %v674_v50  ;;  %v689_v59 = vsel %vm568_vm1, %v681_v57, 0.0 }
 0x2b3   : > { %v676_v55 = vsub.f32 %v653_v41, %v672_v52  ;;  %v683_v56 = vsel %vm568_vm1, %v679_v53, 0.0  ;;  %v682_v61 = vmul.f32 %v678_v54, %v678_v54 }
 0x2b4   : > { %684 = vadd.xlane.f32.xlu0 %v683_v56 }
 0x2b5   : > { %v680_v58 = vmul.f32 %v676_v55, %v676_v55  ;;  %v692_v62 = vsel %vm568_vm1, %v682_v61, 0.0 }
 0x2b7   : > { %v686_v60 = vsel %vm568_vm1, %v680_v58, 0.0 }
 0x2b8   : > { %690 = vadd.xlane.f32.xlu0 %v689_v59  ;;  %687 = vadd.xlane.f32.xlu1 %v686_v60 }
 0x2bc   : > { %693 = vadd.xlane.f32.xlu1 %v692_v62 }
 0x33d   : > { %v685_v3 = vpop.xlane.xlu0 %684 }
 0x33e   : > { %v695_v4 = vmul.f32 0.015625, %v685_v3 }
 0x340   : > { %v699_v5 = vadd.f32 1e-05, %v695_v4 }
 0x341   : > { %v688_v6 = vpop.xlane.xlu1 %687  ;;  %v691_v7 = vpop.xlane.xlu0 %690 }
 0x342   : > { %1173 = vrsqrt.f32 %v699_v5  ;;  %v696_v8 = vmul.f32 0.015625, %v688_v6  ;;  %v697_v9 = vmul.f32 0.015625, %v691_v7 }
 0x344   : > { %v700_v10 = vadd.f32 1e-05, %v696_v8  ;;  %v701_v11 = vadd.f32 1e-05, %v697_v9 }
 0x345   : > { %v694_v12 = vpop.xlane.xlu1 %693 }
 0x346   : > { %1175 = vrsqrt.f32 %v700_v10  ;;  %v698_v13 = vmul.f32 0.015625, %v694_v12 }
 0x347   : > { %1177 = vrsqrt.f32 %v701_v11 }
 0x348   : > { %v702_v14 = vadd.f32 1e-05, %v698_v13 }
 0x34a   : > { %1179 = vrsqrt.f32 %v702_v14 }
 0x34f   : > { %v1174_v15 = vpop.eup %1173 }
 0x350   : > { %v707_v16 = vmul.f32 %v1174_v15, %v675_v49 }
 0x352   : > { %v717_v21 = vmul.f32 %v1002_v17, %v707_v16 }
 0x353   : > { %v1176_v18 = vpop.eup %1175 }
 0x354   : > { %v1178_v19 = vpop.eup %1177  ;;  %v708_v20 = vmul.f32 %v1176_v18, %v676_v55  ;;  %v727_v27 = vadd.f32 %v1003_v23, %v717_v21 }
 0x355   : > { %v709_v22 = vmul.f32 %v1178_v19, %v677_v48 }
 0x356   : > { %v718_v24 = vmul.f32 %v1002_v17, %v708_v20 }
 0x357   : > { %v1180_v25 = vpop.eup %1179  ;;  %v719_v29 = vmul.f32 %v1002_v17, %v709_v22 }
 0x358   : > { %v710_v26 = vmul.f32 %v1180_v25, %v678_v54  ;;  %v728_v28 = vadd.f32 %v1003_v23, %v718_v24 }
 0x359   : > { %v729_v32 = vadd.f32 %v1003_v23, %v719_v29 }
 0x35a   : > { %v739_v30 = vpack.c.bf16 %v728_v28, %v727_v27  ;;  %v720_v31 = vmul.f32 %v1002_v17, %v710_v26 }
 0x35c   : > { %1070 = vmatprep.mubr.msk.bf16.mxu0 %vm568_vm1, %v739_v30  ;;  %v730_v33 = vadd.f32 %v1003_v23, %v720_v31 }
 0x35e   : > { %v740_v34 = vpack.c.bf16 %v730_v33, %v729_v32 }
 0x360   : > { %1071 = vmatmul.mubr.msk.bf16.vlgmr.msra.gmra.mxu0 %vm568_vm1, %v740_v34 }
 0x420   : > { %v1072_v35 = vpop.f32.mrf.mxu0 }
 0x422   : > { %v805_v36 = vpop.f32.mrf.mxu0 }
 0x424   : > { %v1073_v37 = vpop.f32.mrf.mxu0 }
 0x425   : > { %v1026_v38 = vpack.c.bf16 %v1073_v37, %v1072_v35 }
 0x426   : > { %v808_v39 = vpop.f32.mrf.mxu0 }
 0x427   : > { %1028 = vst [vmem:[%s433_s20 + $0x8] sm:$0xff] %v1026_v38   ;;  %v1021_v40 = vpack.c.bf16 %v808_v39, %v805_v36 }
 0x429   : > { %1022 = vst [vmem:[%s433_s20] sm:$0xff] %v1021_v40  }
 0x42a   : > { %1328 = shalt.err (!%p1325_p6)
}
 0x42b   : > { %s1329_s15 = scalar_lea.hbm %s1710_s8, 256  ;;  %s1333_s4 = scalar_lea.hbm %s1762_s9, 512 }
 0x42c   : > { %p1330_p7 = scmp.ne.s32.totalorder %s1710_s8, %s1329_s15  ;;  %p1334_p2 = scmp.lt.s32.totalorder %s1710_s8, %s1762_s9 }
 0x42d   : > { %p1335_p3 = scmp.lt.s32.totalorder %s1333_s4, %s1329_s15 }
 0x42e   : > { %p1331_p5 = pnand %p1330_p7, %p1797_p13 }
 0x42f   : > { %p1336_p12 = por %p1335_p3, %p1334_p2 }
 0x430   : > { %p1332_p8 = pneg %p1331_p5 }
 0x432   : > { %p1337_p9 = pnand %p1336_p12, %p1332_p8 }
 0x434   : > { %1340 = shalt.err (!%p1337_p9)
}
 0x435   : > { %s1403_s29 = smov 64   ;;  %s1404_s23 = smov 4  }
 0x436   : > { %1090 = dma.vmem_to_hbm [thread:$0]  (%p1797_p13), %s1705_s22, 256, %s1710_s8, %s829_s11, %s1403_s29, %s1403_s29, %s1404_s23  }
 0x437 PF: > { %s857_s20 = sand.u32 1, %s1379_s30   ;;  %p1798_p0 = scmp.ne.s32.totalorder %s1777_s16, 0 }
 0x438   : > { %p1799_p11 = scmp.ge.s32.totalorder %s1391_s12, 2  ;;  %s858_s24 = scalar_lea.sflag [#allocation4], %s857_s20 }
 0x43a   : > { %p1110_p10 = pnand %p1799_p11, %p1798_p0 }
 0x43c   : > { %p1111_p1 = pneg %p1110_p10 }
 0x43e   : > { %1374 = dma.done.wait (%p1111_p1), %s858_s24, 256  }
 0x43f   : > { %1376 = vsyncadd (%p1111_p1), %s858_s24, 4294967040  ;;  %s1800_s12 = sld [smem:[#allocation18_spill]]  ;;  %s1803_s30 = smov %s1383_s10 }
 0x440   : > { %s1801_s18 = sld [smem:[#allocation17_spill]] }
 0x441   : > { %s1802_s11 = sld [smem:[#allocation19_spill]] }
 0x445   : > { %p26_p4 = scmp.ge.s32.totalorder %s1800_s12, 4  }
 0x446   : > { %s1804_s10 = smov %s1801_s18 }
 0x447   :  { %28 = sbr.rel (!%p26_p4) target bundleno = 13 (0xd), region = 126 }
 0x44c   :  { %863 = vsyncpa [#allocation3], 1 }
 0x44d   :  { %865 = vsyncpa [#allocation3 + $0x1], 1 }
 0x44e   :  { %866 = vsyncpa [#allocation6], 1 }
 0x44f   :  { %868 = vsyncpa [#allocation6 + $0x1], 1 }
 0x450   :  { %869 = vsyncpa [#allocation9], 1 }
 0x451   :  { %870 = vsyncpa [#allocation4], 1 }
 0x452   :  { %872 = vsyncpa [#allocation4 + $0x1], 1 }

</bundles_post_ra>
